<compile_context>
chip_gen: v5e
topology: v5e:2x2
jax: 0.10.0
libtpu: 0.0.40
codegen_flags: <defaults>
</compile_context>

<pallas_src>
import functools

import jax
import jax.numpy as jnp
from jax.experimental import pallas as pl
from jax.experimental.pallas import tpu as pltpu


def _vmem_capacity_bytes():
    """Physical VMEM per core; safe fallback if the query is unavailable."""
    try:
        cap = int(getattr(pltpu.get_tpu_info(), "vmem_capacity_bytes", 0))
        if cap > 0:
            return cap
    except Exception:
        pass
    return 128 << 20  # v5e / v6e


def _largest_divisor_at_most(n, cap, multiple_of=1):
    best = None
    for d in range(1, n + 1):
        if n % d == 0 and d <= cap and d % multiple_of == 0:
            best = d
    return best


def _make_kernel(bs, tc, th, W, tw, dtype):
    bs2 = bs * bs
    n_wc = W // tw

    def kernel(x_ref, o_ref):
        # x_ref: (bs*bs, tc, th, W)   all bs^2 source-channel groups of the tile
        # o_ref: (tc, th, bs*bs*W)    row-major identical to (tc, th*bs, W*bs)
        #
        # 0/1 lane-interleave matrices, built in-kernel (iota + compare).
        # Exact in any float dtype; no HBM traffic, cheap VPU filler.
        row = jax.lax.broadcasted_iota(jnp.int32, (tw, tw * bs), 0)
        col = jax.lax.broadcasted_iota(jnp.int32, (tw, tw * bs), 1)
        scat = [(col == row * bs + b2).astype(dtype) for b2 in range(bs)]

        for b1 in range(bs):
            for wc in range(n_wc):
                acc = None
                for b2 in range(bs):
                    xm = x_ref[b1 * bs + b2, :, :, wc * tw:(wc + 1) * tw]
                    xm = xm.reshape(tc * th, tw)   # free: tc == 1 or th % 8 == 0
                    part = jnp.dot(xm, scat[b2],
                                   preferred_element_type=jnp.float32)
                    # Different b2 hit disjoint output columns -> exact sum.
                    acc = part if acc is None else acc + part
                col0 = b1 * W * bs + wc * tw * bs
                o_ref[:, :, col0:col0 + tw * bs] = (
                    acc.reshape(tc, th, tw * bs).astype(dtype))

    return kernel


@functools.partial(jax.jit, static_argnums=(1,))
def depth_to_space(x, block_size):
    bs = block_size
    bs2 = bs * bs
    N, C, H, W = x.shape
    assert C % bs2 == 0, "C must be divisible by block_size**2"
    assert jnp.issubdtype(x.dtype, jnp.floating), "floating-point inputs only"
    C_out = C // bs2
    item = jnp.dtype(x.dtype).itemsize
    lanes = bs2 * W

    # ---- generation-aware budget for one (input + output) block pair ----
    cap = _vmem_capacity_bytes()
    budget = min(16 << 20, cap // 8)          # ~16 MiB v5e/v6e, ~8 MiB v7x
    per_ch_row = 2 * bs2 * W * item           # in + out bytes of one (c_out, h) row
    rows_cap = max(1, budget // per_ch_row)   # max tc * th

    # ---- H tiling (th must be a multiple of 8 or the full H) ----
    if H <= rows_cap:
        th = H
    else:
        th = _largest_divisor_at_most(H, rows_cap, 8)
        if th is None:
            mult8 = [d for d in range(8, H + 1, 8) if H % d == 0]
            th = min(mult8) if mult8 else H

    # ---- channel tiling (batch channels only when the M-merge is layout-free) ----
    if th % 8 == 0:
        tc = _largest_divisor_at_most(C_out, max(1, rows_cap // th)) or 1
    else:
        # TODO(synk): pad H to a multiple of 8 wrapper-side (crop after) so
        # channel batching stays available for odd H (v6e MXU sizing).
        tc = 1

    n_ct = C_out // tc
    n_ht = H // th

    # ---- v7x has 2 TensorCores: ensure the parallel grid has >= 2 steps ----
    if N * n_ct * n_ht < 2:
        if C_out // tc == 1 and C_out > 1:
            tc = _largest_divisor_at_most(C_out, max(1, C_out // 2)) or tc
        elif H // th == 1:
            half = _largest_divisor_at_most(H, max(1, H // 2), 8)
            if half is not None:
                th = half
        n_ct = C_out // tc
        n_ht = H // th

    # ---- in-kernel W chunking: bounds matmul work at ~2*tw*bs flops/element
    #      and keeps every output store a contiguous tw*bs-lane slice ----
    if W <= 256:
        tw = W
    else:
        cand = (_largest_divisor_at_most(W, 256, 128)
                or _largest_divisor_at_most(W, 256, 8)
                or _largest_divisor_at_most(W, 256))
        tw = cand if (cand is not None and cand >= 64) else W

    # ---- raise the scoped VMEM limit to match the chosen block sizes ----
    block_pair = tc * th * per_ch_row                     # in + out, single-buffered
    kernel_tmp = bs * tw * tw * bs * item + 4 * tc * th * tw * bs * 4
    vmem_limit = 2 * block_pair + kernel_tmp + (8 << 20)  # x2 for double buffering
    vmem_limit = int(max(32 << 20, min(vmem_limit, cap - (16 << 20))))

    # Free view (metadata only): DCR channel index = b * C_out + c.
    xv = x.reshape(N, bs2, C_out, H, W)

    kernel = _make_kernel(bs, tc, th, W, tw, x.dtype)

    out4 = pl.pallas_call(
        kernel,
        out_shape=jax.ShapeDtypeStruct((N, C_out, H, lanes), x.dtype),
        grid=(N, n_ct, n_ht),
        in_specs=[
            pl.BlockSpec((None, bs2, tc, th, W),
                         lambda n, ct, ht: (n, 0, ct, ht, 0)),
        ],
        out_specs=pl.BlockSpec((None, tc, th, lanes),
                               lambda n, ct, ht: (n, ct, ht, 0)),
        compiler_params=pltpu.CompilerParams(
            dimension_semantics=("parallel", "parallel", "parallel"),
            vmem_limit_bytes=vmem_limit),
    )(xv)

    # Row-major (N, C_out, H, bs*bs*W) is bit-identical to (N, C_out, H*bs, W*bs):
    # h*(bs*bs*W) + b1*(W*bs) + w*bs + b2 == (h*bs+b1)*(W*bs) + (w*bs+b2),
    # so this final reshape is free (no transpose, no data movement).
    return out4.reshape(N, C_out, H * bs, W * bs)


if __name__ == "__main__":
    key = jax.random.PRNGKey(0)
    N, C, H, W, bs = 2, 4, 16, 16, 2
    x = jax.random.normal(key, (N, C, H, W), dtype=jnp.float32)

    y = depth_to_space(x, bs)
    y = jax.block_until_ready(y)

    # Pure-JAX reference matching the PyTorch forward exactly.
    C_out = C // (bs * bs)
    ref = (x.reshape(N, bs, bs, C_out, H, W)
             .transpose(0, 3, 4, 1, 5, 2)
             .reshape(N, C_out, H * bs, W * bs))
    assert y.shape == ref.shape and y.dtype == ref.dtype
    assert jnp.array_equal(y, ref), "DepthToSpace mismatch (f32)"

    # bf16 / multi-output-channel check (exercises channel batching; the 0/1
    # scatter keeps the result bit-exact).
    x2 = jax.random.normal(jax.random.PRNGKey(1), (1, 16, 8, 16), jnp.bfloat16)
    y2 = jax.block_until_ready(depth_to_space(x2, 2))
    ref2 = (x2.reshape(1, 2, 2, 4, 8, 16)
              .transpose(0, 3, 4, 1, 5, 2)
              .reshape(1, 4, 16, 32))
    assert y2.shape == ref2.shape and y2.dtype == ref2.dtype
    assert jnp.array_equal(y2, ref2), "DepthToSpace mismatch (bf16)"

    print("KERNEL_OK")
</pallas_src>

<mosaic_0001>
module attributes {stable_mosaic.version = 11 : i64} {
  func.func @kernel(%arg0: i32, %arg1: i32, %arg2: i32, %arg3: memref<1x4x1x16x16xf32, #tpu.memory_space<vmem>>, %arg4: memref<1x1x16x64xf32, #tpu.memory_space<vmem>>) attributes {dimension_semantics = [#tpu.dimension_semantics<parallel>, #tpu.dimension_semantics<parallel>, #tpu.dimension_semantics<parallel>], iteration_bounds = array<i64: 2, 1, 1>, scalar_prefetch = 0 : i64, scratch_operands = 0 : i64, tpu.core_type = #tpu.core_type<tc>, window_params = [{transform_indices = @transform_0, window_bounds = array<i64: 1, 4, 1, 16, 16>}, {transform_indices = @transform_1, window_bounds = array<i64: 1, 1, 16, 64>}]} {
    %0 = tpu.iota {dimensions = array<i32: 0>} : vector<16x32xi32>
    %1 = tpu.iota {dimensions = array<i32: 1>} : vector<16x32xi32>
    %c2_i32 = arith.constant 2 : i32
    %2 = vector.broadcast %c2_i32 : i32 to vector<16x32xi32>
    %3 = arith.muli %0, %2 : vector<16x32xi32>
    %c0_i32 = arith.constant 0 : i32
    %4 = vector.broadcast %c0_i32 : i32 to vector<16x32xi32>
    %5 = arith.addi %3, %4 : vector<16x32xi32>
    %6 = arith.cmpi eq, %1, %5 : vector<16x32xi32>
    %7 = arith.extui %6 : vector<16x32xi1> to vector<16x32xi32>
    %8 = arith.sitofp %7 : vector<16x32xi32> to vector<16x32xf32>
    %c2_i32_0 = arith.constant 2 : i32
    %9 = vector.broadcast %c2_i32_0 : i32 to vector<16x32xi32>
    %10 = arith.muli %0, %9 : vector<16x32xi32>
    %c1_i32 = arith.constant 1 : i32
    %11 = vector.broadcast %c1_i32 : i32 to vector<16x32xi32>
    %12 = arith.addi %10, %11 : vector<16x32xi32>
    %13 = arith.cmpi eq, %1, %12 : vector<16x32xi32>
    %14 = arith.extui %13 : vector<16x32xi1> to vector<16x32xi32>
    %15 = arith.sitofp %14 : vector<16x32xi32> to vector<16x32xf32>
    %c0 = arith.constant 0 : index
    %c0_1 = arith.constant 0 : index
    %c0_2 = arith.constant 0 : index
    %c0_3 = arith.constant 0 : index
    %c0_4 = arith.constant 0 : index
    %16 = vector.load %arg3[%c0, %c0_1, %c0_2, %c0_3, %c0_4] : memref<1x4x1x16x16xf32, #tpu.memory_space<vmem>>, vector<1x1x1x16x16xf32>
    %17 = vector.shape_cast %16 : vector<1x1x1x16x16xf32> to vector<1x16x16xf32>
    %18 = vector.shape_cast %17 : vector<1x16x16xf32> to vector<16x16xf32>
    %cst = arith.constant dense<0.000000e+00> : vector<16x32xf32>
    %19 = tpu.matmul %18, %8, %cst {dimension_numbers = #tpu.dot_dimension_numbers<[1], [0], [0], [1], [0, 0, 1, 1], [], []>} : vector<16x16xf32>, vector<16x32xf32>, vector<16x32xf32> -> vector<16x32xf32>
    %c0_5 = arith.constant 0 : index
    %c1 = arith.constant 1 : index
    %c0_6 = arith.constant 0 : index
    %c0_7 = arith.constant 0 : index
    %c0_8 = arith.constant 0 : index
    %20 = vector.load %arg3[%c0_5, %c1, %c0_6, %c0_7, %c0_8] : memref<1x4x1x16x16xf32, #tpu.memory_space<vmem>>, vector<1x1x1x16x16xf32>
    %21 = vector.shape_cast %20 : vector<1x1x1x16x16xf32> to vector<1x16x16xf32>
    %22 = vector.shape_cast %21 : vector<1x16x16xf32> to vector<16x16xf32>
    %cst_9 = arith.constant dense<0.000000e+00> : vector<16x32xf32>
    %23 = tpu.matmul %22, %15, %cst_9 {dimension_numbers = #tpu.dot_dimension_numbers<[1], [0], [0], [1], [0, 0, 1, 1], [], []>} : vector<16x16xf32>, vector<16x32xf32>, vector<16x32xf32> -> vector<16x32xf32>
    %24 = arith.addf %19, %23 : vector<16x32xf32>
    %25 = vector.shape_cast %24 : vector<16x32xf32> to vector<1x16x32xf32>
    %c0_10 = arith.constant 0 : index
    %c0_11 = arith.constant 0 : index
    %c0_12 = arith.constant 0 : index
    %c0_13 = arith.constant 0 : index
    %26 = vector.load %arg4[%c0_10, %c0_11, %c0_12, %c0_13] : memref<1x1x16x64xf32, #tpu.memory_space<vmem>>, vector<1x1x16x32xf32>
    %27 = vector.shape_cast %26 : vector<1x1x16x32xf32> to vector<1x16x32xf32>
    %28 = vector.shape_cast %25 : vector<1x16x32xf32> to vector<1x1x16x32xf32>
    tpu.vector_store %arg4[%c0_10, %c0_11, %c0_12, %c0_13], %28 {strides = array<i32>} : memref<1x1x16x64xf32, #tpu.memory_space<vmem>>, vector<1x1x16x32xf32>,
    %c0_14 = arith.constant 0 : index
    %c2 = arith.constant 2 : index
    %c0_15 = arith.constant 0 : index
    %c0_16 = arith.constant 0 : index
    %c0_17 = arith.constant 0 : index
    %29 = vector.load %arg3[%c0_14, %c2, %c0_15, %c0_16, %c0_17] : memref<1x4x1x16x16xf32, #tpu.memory_space<vmem>>, vector<1x1x1x16x16xf32>
    %30 = vector.shape_cast %29 : vector<1x1x1x16x16xf32> to vector<1x16x16xf32>
    %31 = vector.shape_cast %30 : vector<1x16x16xf32> to vector<16x16xf32>
    %cst_18 = arith.constant dense<0.000000e+00> : vector<16x32xf32>
    %32 = tpu.matmul %31, %8, %cst_18 {dimension_numbers = #tpu.dot_dimension_numbers<[1], [0], [0], [1], [0, 0, 1, 1], [], []>} : vector<16x16xf32>, vector<16x32xf32>, vector<16x32xf32> -> vector<16x32xf32>
    %c0_19 = arith.constant 0 : index
    %c3 = arith.constant 3 : index
    %c0_20 = arith.constant 0 : index
    %c0_21 = arith.constant 0 : index
    %c0_22 = arith.constant 0 : index
    %33 = vector.load %arg3[%c0_19, %c3, %c0_20, %c0_21, %c0_22] : memref<1x4x1x16x16xf32, #tpu.memory_space<vmem>>, vector<1x1x1x16x16xf32>
    %34 = vector.shape_cast %33 : vector<1x1x1x16x16xf32> to vector<1x16x16xf32>
    %35 = vector.shape_cast %34 : vector<1x16x16xf32> to vector<16x16xf32>
    %cst_23 = arith.constant dense<0.000000e+00> : vector<16x32xf32>
    %36 = tpu.matmul %35, %15, %cst_23 {dimension_numbers = #tpu.dot_dimension_numbers<[1], [0], [0], [1], [0, 0, 1, 1], [], []>} : vector<16x16xf32>, vector<16x32xf32>, vector<16x32xf32> -> vector<16x32xf32>
    %37 = arith.addf %32, %36 : vector<16x32xf32>
    %38 = vector.shape_cast %37 : vector<16x32xf32> to vector<1x16x32xf32>
    %c0_24 = arith.constant 0 : index
    %c0_25 = arith.constant 0 : index
    %c0_26 = arith.constant 0 : index
    %c32 = arith.constant 32 : index
    %39 = vector.load %arg4[%c0_24, %c0_25, %c0_26, %c32] : memref<1x1x16x64xf32, #tpu.memory_space<vmem>>, vector<1x1x16x32xf32>
    %40 = vector.shape_cast %39 : vector<1x1x16x32xf32> to vector<1x16x32xf32>
    %41 = vector.shape_cast %38 : vector<1x16x32xf32> to vector<1x1x16x32xf32>
    tpu.vector_store %arg4[%c0_24, %c0_25, %c0_26, %c32], %41 {strides = array<i32>} : memref<1x1x16x64xf32, #tpu.memory_space<vmem>>, vector<1x1x16x32xf32>,
    return
  }
  func.func @transform_0(%arg0: i32, %arg1: i32, %arg2: i32) -> (i32, i32, i32, i32, i32) {
    %c0_i32 = arith.constant 0 : i32
    %c0_i32_0 = arith.constant 0 : i32
    %c0_i32_1 = arith.constant 0 : i32
    return %arg0, %c0_i32, %arg1, %arg2, %c0_i32_0 : i32, i32, i32, i32, i32
  }
  func.func @transform_1(%arg0: i32, %arg1: i32, %arg2: i32) -> (i32, i32, i32, i32) {
    %c0_i32 = arith.constant 0 : i32
    %c0_i32_0 = arith.constant 0 : i32
    return %arg0, %arg1, %arg2, %c0_i32 : i32, i32, i32, i32
  }
}

</mosaic_0001>

<bundles_post_ra>
// kernel: depth_to_space.1
= control target key start
LH: loop header
LB: loop body
LE: loop exit
PB: predicated region body
PF: predicated region fallthrough
CT: control target
= control target key end

     0   :  { %6 = vsyncpa [#allocation3], 0  ;;  %s777_s0 = inlined_call_operand.hbm [shape: f32[2,4,1,16,16], index: 0, kind: input, shape index: {}]   ;;  %s778_s1 = inlined_call_operand.vmem [shape: f32[2,1,16,64], index: 1, kind: output, shape index: {}]  }
   0x1   :  { %8 = vsyncpa [#allocation3 + $0x1], 0  ;;  %s663_s6 = smov 0   ;;  %s665_s7 = smov 0  }
   0x2   :  { %s667_s8 = smov 0   ;;  %s669_s9 = smov 0  }
   0x3   :  { %s671_s10 = smov 0   ;;  %s673_s11 = smov 0  }
   0x4 LB: > { %s467_s12 = sadd.s32 4294967295, %s647_s11   ;;  %s33_s13 = sadd.s32 1, %s643_s10  ;;  %s647_s11 = sphi %s673_s11, %s14_s11   ;;  %s643_s10 = sphi %s671_s10, %s787_s10   ;;  %s639_s9 = sphi %s669_s9, %s786_s9   ;;  %s635_s8 = sphi %s667_s8, %s785_s8   ;;  %s631_s7 = sphi %s665_s7, %s784_s7   ;;  %s627_s6 = sphi %s663_s6, %s783_s6  }
   0x5   : > { %p35_p0 = scmp.ge.s32.totalorder %s33_s13, 2  ;;  %s44_s14 = sadd.s32 1, %s635_s8 }
   0x6   : > { %p51_p1 = scmp.ne.s32.totalorder %s635_s8, %s631_s7  ;;  %p52_p2 = scmp.eq.s32.totalorder %s647_s11, 0 }
   0x7   : > { %s789_s13 = smov (%p35_p0, %s33_s13), 0  ;;  %p57_p4 = scmp.ne.s32.totalorder %s631_s7, %s627_s6 }
   0x8   : > { %p699_p3 = por %p52_p2, %p51_p1  ;;  %s37_s16 = ssub.s32 %s643_s10, %s789_s13 }
   0x9   : > { %p58_p5 = scmp.eq.s32.totalorder %s467_s12, 0  ;;  %p42_p6 = scmp.eq.s32.totalorder %s37_s16, 0 }
   0xa   : > { %p514_p8 = scmp.lt.s32.totalorder %s647_s11, 2  ;;  %s111_s19 = sand.u32 1, %s635_s8  }
   0xb   : > { %p706_p7 = por %p58_p5, %p57_p4  ;;  %s506_s20 = sshll.u32 %s643_s10, 6 }
   0xc   : > { %s712_s18 = scalar_select %p42_p6, %s635_s8, %s44_s14  }
   0xd   : > { %s471_s21 = sshll.u32 %s111_s19, 6  ;;  %s124_s24 = scalar_lea.hbm %s777_s0, %s506_s20 }
   0xe   : > { %s125_s25 = sshll.u32 %s124_s24, 4  ;;  %s115_s26 = scalar_lea.vmem [#allocation2], %s471_s21  ;;  %s126_s25 = int_to_ptr.hbm [resolvable:$true] %s125_s25 }
   0xf   : > { %s127_s27 = sshll.u32 %s115_s26, 4  ;;  %p511_p9 = pnand %p514_p8, %p699_p3  ;;  %s128_s27 = int_to_ptr.vmem [resolvable:$true] %s127_s27 }
  0x10   : > { %p474_p10 = scmp.ge.s32.totalorder %s647_s11, 1  ;;  %p135_p11 = scmp.lt.s32.totalorder %s647_s11, 3 }
  0x11   : > { %s112_s28 = scalar_lea.sflag [#allocation3], %s111_s19  ;;  %s649_s29 = smov 128  }
  0x12   : > { %s650_s30 = smov 8   ;;  %p136_p12 = pnand %p474_p10, %p135_p11 }
  0x13   : > { %513 = dma.hbm_to_vmem [thread:$0]  (!%p511_p9), %s126_s25, 1024, %s128_s27, %s112_s28, %s649_s29, %s649_s29, %s650_s30  }
  0x14   : > { %139 = sbr.rel (%p136_p12) target bundleno = 298 (0x12a), region = 24  ;;  %s141_s2 = sand.u32 (!%p136_p12), 1, %s631_s7  }
  0x15   : > { %s475_s3 = sshll.u32 (!%p136_p12), %s141_s2, 6  ;;  %s142_s4 = scalar_lea.sflag (!%p136_p12), [#allocation3], %s141_s2 }
  0x16   : > { %s724_s5 = scalar_lea.vmem (!%p136_p12), [#allocation2], %s475_s3 }
  0x19   : > { %622 = dma.done.wait (%p706_p7), %s142_s4, 1024  }
  0x1a   : > { %624 = vsyncadd (%p706_p7), %s142_s4, 4294966272  ;;  %v188_v0 = vlaneseq  ;;  %v651_v9 = vmov 1.0   ;;  %vm214_vm2 = vcmask 130048   ;;  %v492_v10 = vld [vmem:[%s724_s5 + $0x20] sm:$0xff]  ;;  %v494_v11 = vld [vmem:[%s724_s5 + $0x30] sm:$0xff]  ;;  %p175_p13 = scmp.lt.s32.totalorder %s639_s9, 1 }
  0x1b   : > { %v482_v12 = vld [vmem:[%s724_s5 + $0x10] sm:$0xff]  ;;  %v209_v13 = vld [vmem:[%s724_s5] sm:$0xff]  ;;  %v493_v14 = vld [vmem:[%s724_s5 + $0x28] sm:$0xff]  ;;  %vm273_vm5 = vcmask 261120   ;;  %s652_s16 = smov 32   ;;  %vm348_vm6 = vcmask 523520  }
  0x1c   : > { %v189_v1 = vshrl.u32 %v188_v0, 7  ;;  %v192_v3 = vand.u32 127, %v188_v0  ;;  %v495_v15 = vld [vmem:[%s724_s5 + $0x38] sm:$0xff]  ;;  %v210_v17 = vld [vmem:[%s724_s5 + $0x8] sm:$0xff]  ;;  %s791_s9 = smov (!%p175_p13, %s639_s9), 1 }
  0x1d   : > { %v483_v16 = vld [vmem:[%s724_s5 + $0x18] sm:$0xff]  ;;  %s507_s6 = sshll.u32 %s791_s9, 4 }
  0x1e   : > { %v190_v2 = vadd.s32 8, %v189_v1  ;;  %v193_v4 = vmul.u32 2, %v189_v1  ;;  %s186_s15 = scalar_lea.vmem %s778_s1, %s507_s6 }
  0x20   : > { %v194_v5 = vmul.u32 2, %v190_v2  ;;  %v201_v6 = vadd.s32 1, %v193_v4  ;;  %vm730_vm1 = vcmp.eq.s32.totalorder %v192_v3, %v193_v4 }
  0x22   : > { %v202_v7 = vadd.s32 1, %v194_v5  ;;  %vm196_vm0 = vcmp.eq.s32.totalorder %v192_v3, %v194_v5  ;;  %vm203_vm4 = vcmp.eq.s32.totalorder %v192_v3, %v201_v6 }
  0x23   : > { %500 = vmatpush.msk.msra.mxu3 %vm196_vm0, %v651_v9  ;;  %488 = vmatpush.msk.msra.mxu1 %vm196_vm0, %v651_v9 }
  0x24   : > { %vm204_vm3 = vcmp.eq.s32.totalorder %v192_v3, %v202_v7 }
  0x25   : > { %496 = vmatpush.msk.msra.mxu2 %vm204_vm3, %v651_v9  ;;  %501 = vmatpush.msk.msra.mxu3 %vm730_vm1, %v651_v9 }
  0x26   : > { %502 = vmatmul.msk.f32.vlgmr.msra.gmra.mxu3 %vm214_vm2, %v492_v10  ;;  %484 = vmatpush.msk.msra.mxu0 %vm204_vm3, %v651_v9 }
  0x27   : > { %497 = vmatpush.msk.msra.mxu2 %vm203_vm4, %v651_v9  ;;  %489 = vmatpush.msk.msra.mxu1 %vm730_vm1, %v651_v9 }
  0x28   : > { %498 = vmatmul.msk.f32.vlgmr.msra.gmra.mxu2 %vm214_vm2, %v494_v11  ;;  %485 = vmatpush.msk.msra.mxu0 %vm203_vm4, %v651_v9 }
  0x29   : > { %486 = vmatmul.msk.f32.vlgmr.msra.gmra.mxu0 %vm214_vm2, %v482_v12  ;;  %490 = vmatmul.msk.f32.vlgmr.msra.gmra.mxu1 %vm214_vm2, %v209_v13 }
  0x2e   : > { %503 = vmatmul.msk.f32.gmra.mxu3 %vm214_vm2, %v493_v14 }
  0x30   : > { %499 = vmatmul.msk.f32.gmra.mxu2 %vm214_vm2, %v495_v15 }
  0x31   : > { %487 = vmatmul.msk.f32.gmra.mxu0 %vm214_vm2, %v483_v16  ;;  %491 = vmatmul.msk.f32.gmra.mxu1 %vm214_vm2, %v210_v17 }
  0xa6   : > { %v238_v18 = vpop.f32.mrf.mxu0  ;;  %v267_v19 = vpop.f32.mrf.mxu1 }
  0xa7   : > { %v268_v20 = vadd.f32 %v267_v19, %v238_v18 }
  0xa9   : > { %v334_v21 = vpop.f32.mrf.mxu3  ;;  %274 = vst.msk [vmem:[%s186_s15] sm:$0xff] %vm273_vm5, %v268_v20 }
  0xab   : > { %v305_v22 = vpop.f32.mrf.mxu2 }
  0xac   : > { %v335_v23 = vadd.f32 %v334_v21, %v305_v22 }
  0xae   : > { %342 = vrot.lane.b32.xlu0 %v335_v23, %s652_s16  ;;  %v241_v27 = vpop.f32.mrf.mxu0  ;;  %v270_v28 = vpop.f32.mrf.mxu1 }
  0xaf   : > { %v271_v29 = vadd.f32 %v270_v28, %v241_v27 }
  0xb1   : > { %v337_v24 = vpop.f32.mrf.mxu3  ;;  %275 = vst.msk [vmem:[%s186_s15 + $0x8] sm:$0xff] %vm273_vm5, %v271_v29 }
  0xb3   : > { %v308_v25 = vpop.f32.mrf.mxu2 }
  0xb4   : > { %v338_v26 = vadd.f32 %v337_v24, %v308_v25 }
  0xb6   : > { %344 = vrot.lane.b32.xlu0 %v338_v26, %s652_s16 }
 0x120   : > { %v343_v30 = vpop.permute.xlu0 %342 }
 0x121   : > { %349 = vst.msk [vmem:[%s186_s15] sm:$0xff] %vm348_vm6, %v343_v30 }
 0x128   : > { %v345_v31 = vpop.permute.xlu0 %344 }
 0x129   : > { %350 = vst.msk [vmem:[%s186_s15 + $0x8] sm:$0xff] %vm348_vm6, %v345_v31 }
 0x12a PF: > { %s14_s11 = sadd.s32 1, %s647_s11   ;;  %s783_s6 = smov %s631_s7 }
 0x12b   : > { %p11_p0 = scmp.ge.s32.totalorder %s14_s11, 4   ;;  %s784_s7 = smov %s635_s8 }
 0x12c   : > { %s785_s8 = smov %s712_s18  ;;  %s786_s9 = smov %s643_s10 }
 0x12d   : > { %s787_s10 = smov %s789_s13  ;;  %13 = sbr.rel (!%p11_p0) target bundleno = 4 (0x4), region = 67 }
 0x132   :  { %389 = vsyncpa [#allocation3], 1 }
 0x133   :  { %391 = vsyncpa [#allocation3 + $0x1], 1 }

</bundles_post_ra>
